<compile_context>
chip_gen: v5e
topology: v5e:2x2
jax: 0.10.0
libtpu: 0.0.40
codegen_flags: <defaults>
</compile_context>

<pallas_src>
import jax
import jax.numpy as jnp
from jax.experimental import pallas as pl
from jax.experimental.pallas import tpu as pltpu

_EPS = 1e-12  # matches torch.nn.functional.normalize default eps


# --------------------------------------------------------------------------
# hardware-derived sizing helpers
# --------------------------------------------------------------------------
def _vmem_capacity_bytes() -> int:
    try:
        return int(pltpu.get_tpu_info().vmem_capacity_bytes)
    except Exception:
        return 64 << 20  # conservative fallback (v7x per-TC VMEM)


def _block_byte_target(vmem_cap: int) -> int:
    # Target a few MiB per block (~85%+ of HBM roofline); pipeline footprint
    # is ~4x block bytes, so this stays safe on v5e/v6e/v7x alike.
    return max(1 << 20, min(8 << 20, vmem_cap // 16))


def _vmem_limit_bytes(vmem_cap: int) -> int:
    # Raise past the 16/32 MiB default scoped limit, but leave headroom on
    # v7x's 64 MiB physical VMEM (cap at 3/4 of capacity).
    return max(32 << 20, min(vmem_cap * 3 // 4, 96 << 20))


# --------------------------------------------------------------------------
# kernels
# --------------------------------------------------------------------------
def _l2norm_over_c_kernel(x_ref, o_ref):
    # x_ref: (1, C, tile_l) block; normalize over C (axis 1, non-lane axis).
    x = x_ref[...].astype(jnp.float32)
    ss = jnp.sum(x * x, axis=1, keepdims=True)            # (1, 1, tile_l)
    inv = jax.lax.rsqrt(jnp.maximum(ss, _EPS * _EPS))      # == 1 / max(||x||, eps)
    o_ref[...] = (x * inv).astype(o_ref.dtype)


def _l2norm_over_lanes_kernel(x_ref, o_ref):
    # x_ref: (tile_r, C) block; normalize each row over C (lane axis).
    x = x_ref[...].astype(jnp.float32)
    ss = jnp.sum(x * x, axis=-1, keepdims=True)            # (tile_r, 1)
    inv = jax.lax.rsqrt(jnp.maximum(ss, _EPS * _EPS))
    o_ref[...] = (x * inv).astype(o_ref.dtype)


# --------------------------------------------------------------------------
# pallas_call wrappers
# --------------------------------------------------------------------------
def _l2norm_bcl(x3d: jax.Array) -> jax.Array:
    """Normalize a [B, C, L] array over C; L (spatial) stays on the lane axis."""
    B, C, L = x3d.shape
    itemsize = jnp.dtype(x3d.dtype).itemsize
    vmem_cap = _vmem_capacity_bytes()
    target = _block_byte_target(vmem_cap)

    # Lane-axis tile over L: multiple of 128, or the full L.
    tile_l = max(128, (target // max(1, C * itemsize)) // 128 * 128)
    if tile_l >= L:
        tile_l = L
    # Keep the grid >= 2 steps so v7x can use both TensorCores.
    if B == 1 and tile_l == L and L >= 256:
        half = (L + 1) // 2
        tile_l = max(128, ((half + 127) // 128) * 128)
        if tile_l >= L:
            tile_l = L

    grid = (B, pl.cdiv(L, tile_l))
    return pl.pallas_call(
        _l2norm_over_c_kernel,
        out_shape=jax.ShapeDtypeStruct((B, C, L), x3d.dtype),
        grid_spec=pltpu.PrefetchScalarGridSpec(
            num_scalar_prefetch=0,
            grid=grid,
            in_specs=[pl.BlockSpec((1, C, tile_l), lambda b, j: (b, 0, j))],
            out_specs=pl.BlockSpec((1, C, tile_l), lambda b, j: (b, 0, j)),
        ),
        compiler_params=pltpu.CompilerParams(
            dimension_semantics=("parallel", "parallel"),
            vmem_limit_bytes=_vmem_limit_bytes(vmem_cap),
        ),
    )(x3d)


def _l2norm_rows(x2d: jax.Array) -> jax.Array:
    """Normalize each row of a [N, C] array over C (trailing / lane axis)."""
    N, C = x2d.shape
    itemsize = jnp.dtype(x2d.dtype).itemsize
    vmem_cap = _vmem_capacity_bytes()
    target = _block_byte_target(vmem_cap)

    # Row tile: multiple of 8, or the full N.
    tile_r = max(8, (target // max(1, C * itemsize)) // 8 * 8)
    if tile_r >= N:
        tile_r = N
    # Keep the grid >= 2 steps (v7x dual-TC) when the row count allows it.
    if tile_r == N and N >= 16:
        half = (N + 1) // 2
        tile_r = max(8, ((half + 7) // 8) * 8)
        if tile_r >= N:
            tile_r = N

    grid = (pl.cdiv(N, tile_r),)
    return pl.pallas_call(
        _l2norm_over_lanes_kernel,
        out_shape=jax.ShapeDtypeStruct((N, C), x2d.dtype),
        grid_spec=pltpu.PrefetchScalarGridSpec(
            num_scalar_prefetch=0,
            grid=grid,
            in_specs=[pl.BlockSpec((tile_r, C), lambda i: (i, 0))],
            out_specs=pl.BlockSpec((tile_r, C), lambda i: (i, 0)),
        ),
        compiler_params=pltpu.CompilerParams(
            dimension_semantics=("parallel",),
            vmem_limit_bytes=_vmem_limit_bytes(vmem_cap),
        ),
    )(x2d)


# --------------------------------------------------------------------------
# public entry point (== L2Norm(dim).forward)
# --------------------------------------------------------------------------
def l2norm(x: jax.Array, dim: int = 1) -> jax.Array:
    """Equivalent of PlaceRec L2Norm(dim).forward(x) == F.normalize(x, p=2, dim=dim)."""
    ndim = x.ndim
    if dim < 0:
        dim += ndim
    if ndim == 1:
        return _l2norm_rows(x[None, :])[0]
    if dim == ndim - 1:
        # Reduction over the trailing (lane) axis: flatten leading dims to rows.
        lead = x.shape[:-1]
        y = _l2norm_rows(x.reshape(-1, x.shape[-1]))
        return y.reshape(*lead, x.shape[-1])
    if dim == 1:
        # NC...: free-view reshape to [B, C, prod(rest)], reduce over C.
        B, C = x.shape[0], x.shape[1]
        L = 1
        for s in x.shape[2:]:
            L *= s
        y = _l2norm_bcl(x.reshape(B, C, L))
        return y.reshape(x.shape)
    # TODO(synk): general `dim` strictly between 1 and ndim-1 not implemented.
    raise NotImplementedError(f"unsupported dim={dim} for shape {x.shape}")


if __name__ == "__main__":
    key = jax.random.PRNGKey(0)
    x = jax.random.normal(key, (2, 4, 16, 16), dtype=jnp.float32)  # NCHW

    y = l2norm(x, dim=1)
    y = jax.block_until_ready(y)

    # Reference: F.normalize(x, p=2, dim=1)
    ref = x / jnp.maximum(jnp.sqrt(jnp.sum(x * x, axis=1, keepdims=True)), _EPS)
    assert y.shape == x.shape and y.dtype == x.dtype
    assert jnp.max(jnp.abs(y - ref)) < 1e-5

    # Also exercise the 2D descriptor path (dim=1 == trailing axis).
    x2 = jax.random.normal(jax.random.PRNGKey(1), (6, 32), dtype=jnp.float32)
    y2 = jax.block_until_ready(l2norm(x2, dim=1))
    ref2 = x2 / jnp.maximum(jnp.sqrt(jnp.sum(x2 * x2, axis=1, keepdims=True)), _EPS)
    assert y2.shape == x2.shape and jnp.max(jnp.abs(y2 - ref2)) < 1e-5

    print("KERNEL_OK")
</pallas_src>

<mosaic_0001>
module attributes {stable_mosaic.version = 11 : i64} {
  func.func @_l2norm_over_c_kernel(%arg0: i32, %arg1: i32, %arg2: memref<1x4x256xf32, #tpu.memory_space<vmem>>, %arg3: memref<1x4x256xf32, #tpu.memory_space<vmem>>) attributes {dimension_semantics = [#tpu.dimension_semantics<parallel>, #tpu.dimension_semantics<parallel>], iteration_bounds = array<i64: 2, 1>, scalar_prefetch = 0 : i64, scratch_operands = 0 : i64, tpu.core_type = #tpu.core_type<tc>, window_params = [{transform_indices = @transform_0, window_bounds = array<i64: 1, 4, 256>}, {transform_indices = @transform_1, window_bounds = array<i64: 1, 4, 256>}]} {
    %c0 = arith.constant 0 : index
    %c0_0 = arith.constant 0 : index
    %c0_1 = arith.constant 0 : index
    %0 = vector.load %arg2[%c0, %c0_0, %c0_1] : memref<1x4x256xf32, #tpu.memory_space<vmem>>, vector<1x4x256xf32>
    %1 = arith.mulf %0, %0 : vector<1x4x256xf32>
    %cst = arith.constant dense<0.000000e+00> : vector<1x256xf32>
    %2 = vector.multi_reduction <add>, %1, %cst [1] : vector<1x4x256xf32> to vector<1x256xf32>
    %3 = vector.shape_cast %2 : vector<1x256xf32> to vector<1x1x256xf32>
    %cst_2 = arith.constant 1.000000e-24 : f32
    %4 = vector.broadcast %cst_2 : f32 to vector<1x1x256xf32>
    %5 = arith.maximumf %3, %4 : vector<1x1x256xf32>
    %6 = math.rsqrt %5 : vector<1x1x256xf32>
    %7 = vector.broadcast %6 : vector<1x1x256xf32> to vector<1x4x256xf32>
    %8 = arith.mulf %0, %7 : vector<1x4x256xf32>
    %c0_3 = arith.constant 0 : index
    %c0_4 = arith.constant 0 : index
    %c0_5 = arith.constant 0 : index
    %9 = vector.load %arg3[%c0_3, %c0_4, %c0_5] : memref<1x4x256xf32, #tpu.memory_space<vmem>>, vector<1x4x256xf32>
    tpu.vector_store %arg3[%c0_3, %c0_4, %c0_5], %8 {strides = array<i32>} : memref<1x4x256xf32, #tpu.memory_space<vmem>>, vector<1x4x256xf32>,
    return
  }
  func.func @transform_0(%arg0: i32, %arg1: i32) -> (i32, i32, i32) {
    %c0_i32 = arith.constant 0 : i32
    %c0_i32_0 = arith.constant 0 : i32
    return %arg0, %c0_i32, %arg1 : i32, i32, i32
  }
  func.func @transform_1(%arg0: i32, %arg1: i32) -> (i32, i32, i32) {
    %c0_i32 = arith.constant 0 : i32
    %c0_i32_0 = arith.constant 0 : i32
    return %arg0, %c0_i32, %arg1 : i32, i32, i32
  }
}

</mosaic_0001>

<bundles_post_ra>
// kernel: tpu_custom_call.1
= control target key start
LH: loop header
LB: loop body
LE: loop exit
PB: predicated region body
PF: predicated region fallthrough
CT: control target
= control target key end

     0   :  { %6 = vsyncpa [#allocation3], 0  ;;  %s644_s0 = inlined_call_operand.hbm [shape: f32[2,4,256], index: 0, kind: input, shape index: {}]   ;;  %s645_s1 = inlined_call_operand.hbm [shape: f32[2,4,256], index: 1, kind: output, shape index: {}]  }
   0x1   :  { %8 = vsyncpa [#allocation3 + $0x1], 0 }
   0x2   :  { %9 = vsyncpa [#allocation4], 0 }
   0x3   :  { %11 = vsyncpa [#allocation4 + $0x1], 0  ;;  %s517_s6 = smov 0   ;;  %s519_s7 = smov 0  }
   0x4   :  { %s521_s8 = smov 0   ;;  %s523_s9 = smov 0  }
   0x5   :  { %s525_s10 = smov 0   ;;  %s527_s11 = smov 0  }
   0x6 LB: > { %s310_s12 = sadd.s32 4294967295, %s505_s11   ;;  %s311_s13 = sadd.s32 4294967294, %s505_s11   ;;  %s505_s11 = sphi %s527_s11, %s17_s11   ;;  %s501_s10 = sphi %s525_s10, %s654_s10   ;;  %s497_s9 = sphi %s523_s9, %s653_s9   ;;  %s493_s8 = sphi %s521_s8, %s652_s8   ;;  %s489_s7 = sphi %s519_s7, %s651_s7   ;;  %s485_s6 = sphi %s517_s6, %s650_s6  }
   0x7   : > { %s29_s14 = sadd.s32 1, %s501_s10  ;;  %s38_s15 = sadd.s32 1, %s493_s8 }
   0x8   : > { %p31_p0 = scmp.ge.s32.totalorder %s29_s14, 2  ;;  %p45_p1 = scmp.ne.s32.totalorder %s493_s8, %s489_s7 }
   0x9   : > { %p46_p2 = scmp.eq.s32.totalorder %s505_s11, 0  ;;  %p51_p3 = scmp.ne.s32.totalorder %s489_s7, %s485_s6 }
   0xa   : > { %s656_s14 = smov (%p31_p0, %s29_s14), 0  ;;  %p52_p5 = scmp.eq.s32.totalorder %s310_s12, 0 }
   0xb   : > { %p558_p4 = por %p46_p2, %p45_p1  ;;  %s33_s17 = ssub.s32 %s501_s10, %s656_s14 }
   0xc   : > { %p77_p6 = scmp.eq.s32.totalorder %s310_s12, 1  ;;  %p36_p7 = scmp.eq.s32.totalorder %s33_s17, 0 }
   0xd   : > { %p564_p8 = por %p52_p5, %p51_p3  ;;  %p83_p10 = scmp.eq.s32.totalorder %s311_s13, 1 }
   0xe   : > { %p568_p9 = por %p77_p6, %p45_p1  ;;  %p313_p12 = scmp.ge.s32.totalorder %s505_s11, 2 }
   0xf   : > { %s573_s20 = scalar_select %p36_p7, %s493_s8, %s38_s15  }
  0x10   : > { %p575_p11 = por %p83_p10, %p51_p3  ;;  %p339_p13 = scmp.lt.s32.totalorder %s505_s11, 2 }
  0x11   : > { %s103_s22 = sand.u32 1, %s493_s8   ;;  %s325_s24 = sshll.u32 %s501_s10, 3 }
  0x12   : > { %s314_s23 = sshll.u32 %s103_s22, 3  ;;  %s114_s27 = scalar_lea.hbm %s644_s0, %s325_s24 }
  0x13   : > { %s107_s28 = scalar_lea.vmem [#allocation2], %s314_s23  ;;  %s116_s30 = sshll.u32 %s114_s27, 4  ;;  %s117_s30 = int_to_ptr.hbm [resolvable:$true] %s116_s30 }
  0x14   : > { %s118_s29 = sshll.u32 %s107_s28, 4  ;;  %p332_p0 = pnand %p339_p13, %p558_p4  ;;  %s119_s29 = int_to_ptr.vmem [resolvable:$true] %s118_s29 }
  0x15   : > { %p317_p1 = scmp.ge.s32.totalorder %s505_s11, 1  ;;  %p123_p2 = scmp.lt.s32.totalorder %s505_s11, 3 }
  0x16   : > { %s104_s2 = scalar_lea.sflag [#allocation3], %s103_s22 }
  0x17   : > { %334 = dma.hbm_to_vmem [thread:$0]  (!%p332_p0), %s117_s30, 128, %s119_s29, %s104_s2  }
  0x18   : > { %p124_p3 = pnand %p317_p1, %p123_p2 }
  0x19   : > { %s591_s3 = sand.u32 (!%p124_p3), 1, %s489_s7  }
  0x1a   : > { %127 = sbr.rel (%p124_p3) target bundleno = 85 (0x55), region = 24  ;;  %s318_s4 = sshll.u32 (!%p124_p3), %s591_s3, 3 }
  0x1b   : > { %s130_s5 = scalar_lea.sflag (!%p124_p3), [#allocation3], %s591_s3  ;;  %s133_s12 = scalar_lea.vmem (!%p124_p3), [#allocation2], %s318_s4 }
  0x1f   : > { %476 = dma.done.wait (%p564_p8), %s130_s5, 128  }
  0x20   : > { %478 = vsyncadd (%p564_p8), %s130_s5, 4294967168  ;;  %v155_v0 = vld [vmem:[%s133_s12] sm:$0xff]  ;;  %vm163_vm0 = vcmask 1043456   ;;  %s326_s13 = sshll.u32 %s497_s9, 3  ;;  %s152_s18 = scalar_lea.vmem [#allocation5], %s318_s4 }
  0x21   : > { %v156_v1 = vmul.f32 %v155_v0, %v155_v0  ;;  %s221_s17 = scalar_lea.hbm %s645_s1, %s326_s13  ;;  %s223_s9 = sshll.u32 %s152_s18, 4  ;;  %s224_s9 = int_to_ptr.vmem [resolvable:$true] %s223_s9 }
  0x22   : > { %s225_s22 = sshll.u32 %s221_s17, 4  ;;  %s208_s23 = scalar_lea.sflag [#allocation4], %s591_s3  ;;  %s226_s22 = int_to_ptr.hbm [resolvable:$true] %s225_s22 }
  0x23   : > { %158 = vst [vmem:[#allocation1] ss:$2 sm:$0xff] %v156_v1  ;;  %s437_s24 = sshra.s32 %s226_s22, 4  ;;  %s443_s28 = scalar_lea.hbm %s645_s1, 16  ;;  %s438_s24 = int_to_ptr.hbm [resolvable:$true] %s437_s24 }
  0x24   : > { %s439_s25 = scalar_lea.hbm %s438_s24, 8  ;;  %p444_p7 = scmp.lt.s32.totalorder %s438_s24, %s645_s1 }
  0x25   : > { %p440_p4 = scmp.ne.s32.totalorder %s438_s24, %s439_s25  ;;  %p445_p8 = scmp.lt.s32.totalorder %s443_s28, %s439_s25 }
  0x27   : > { %p441_p5 = pnand %p440_p4, %p568_p9  ;;  %p446_p10 = por %p445_p8, %p444_p7 }
  0x29   : > { %p442_p6 = pneg %p441_p5 }
  0x2a   : > { %v159_v2 = vld.sshfl [vmem:[#allocation1] sm:$0xff pattern:$0x75316420]  ;;  %v160_v3 = vld.sshfl [vmem:[#allocation1 + $0x8] sm:$0xff pattern:$0x75316420] }
  0x2b   : > { %v164_v4 = vsel %vm163_vm0, %v159_v2, 0.0  ;;  %v171_v5 = vsel %vm163_vm0, %v160_v3, 0.0  ;;  %p447_p13 = pnand %p446_p10, %p442_p6 }
  0x2c   : > { %v165_v6 = vrot.slane %v164_v4, 4  ;;  %v172_v7 = vrot.slane %v171_v5, 4 }
  0x2e   : > { %v166_v8 = vadd.f32 %v165_v6, %v164_v4  ;;  %v173_v9 = vadd.f32 %v172_v7, %v171_v5 }
  0x30   : > { %v167_v10 = vrot.slane %v166_v8, 2  ;;  %v174_v11 = vrot.slane %v173_v9, 2 }
  0x32   : > { %v168_v12 = vadd.f32 %v167_v10, %v166_v8  ;;  %v175_v13 = vadd.f32 %v174_v11, %v173_v9 }
  0x34   : > { %v169_v14 = vrot.slane %v168_v12, 1  ;;  %v176_v15 = vrot.slane %v175_v13, 1 }
  0x36   : > { %v170_v16 = vadd.f32 %v169_v14, %v168_v12  ;;  %v177_v17 = vadd.f32 %v176_v15, %v175_v13 }
  0x38   : > { %v178_v18 = vmax.f32 %v170_v16, 1e-24  ;;  %v179_v19 = vmax.f32 %v177_v17, 1e-24 }
  0x3a   : > { %389 = vrsqrt.f32 %v178_v18  ;;  %vm196_vm3 = vweird.f32 %v179_v19  ;;  %vm186_vm5 = vweird.f32 %v178_v18 }
  0x3b   : > { %391 = vrsqrt.f32 %v179_v19 }
  0x40   : > { %v390_v20 = vpop.eup %389 }
  0x41   : > { %v392_v21 = vpop.eup %391  ;;  %v181_v22 = vmul.f32 %v390_v20, %v178_v18  ;;  %vm187_vm2 = vweird.f32 %v390_v20 }
  0x42   : > { %v191_v23 = vmul.f32 %v392_v21, %v179_v19  ;;  %vm197_vm1 = vweird.f32 %v392_v21  ;;  %vm188_vm6 = vmor %vm186_vm5, %vm187_vm2 }
  0x43   : > { %v182_v24 = vmul.f32 %v390_v20, %v181_v22  ;;  %vm198_vm4 = vmor %vm196_vm3, %vm197_vm1 }
  0x44   : > { %v192_v25 = vmul.f32 %v392_v21, %v191_v23 }
  0x45   : > { %v183_v26 = vmul.f32 0.5, %v182_v24 }
  0x46   : > { %v193_v27 = vmul.f32 0.5, %v192_v25 }
  0x47   : > { %v184_v28 = vsub.f32 1.5, %v183_v26 }
  0x48   : > { %v194_v29 = vsub.f32 1.5, %v193_v27 }
  0x49   : > { %v185_v30 = vmul.f32 %v390_v20, %v184_v28 }
  0x4a   : > { %v195_v31 = vmul.f32 %v392_v21, %v194_v29 }
  0x4b   : > { %v189_v34 = vsel %vm188_vm6, %v390_v20, %v185_v30 }
  0x4c   : > { %v199_v32 = vsel %vm198_vm4, %v392_v21, %v195_v31 }
  0x4d   : > { %v202_v33 = vrot.slane %v199_v32, 4 }
  0x4f   : > { %v203_v35 = vsel %vm163_vm0, %v189_v34, %v202_v33 }
  0x50   : > { %v205_v36 = vmul.f32 %v203_v35, %v155_v0 }
  0x52   : > { %206 = vst [vmem:[%s152_s18] sm:$0xff] %v205_v36 }
  0x53   : > { %450 = shalt.err (!%p447_p13)
}
  0x54   : > { %329 = dma.vmem_to_hbm [thread:$0]  (%p568_p9), %s224_s9, 128, %s226_s22, %s208_s23  }
  0x55 PF: > { %s237_s2 = sand.u32 1, %s485_s6   ;;  %p336_p0 = pnand %p313_p12, %p575_p11 }
  0x56   : > { %s238_s3 = scalar_lea.sflag [#allocation4], %s237_s2 }
  0x57   : > { %p337_p1 = pneg %p336_p0 }
  0x59   : > { %480 = dma.done.wait (%p337_p1), %s238_s3, 128  }
  0x5a   : > { %482 = vsyncadd (%p337_p1), %s238_s3, 4294967168  ;;  %s17_s11 = sadd.s32 1, %s505_s11   ;;  %s650_s6 = smov %s489_s7 }
  0x5b   : > { %p14_p2 = scmp.ge.s32.totalorder %s17_s11, 4   ;;  %s651_s7 = smov %s493_s8 }
  0x5c   : > { %s652_s8 = smov %s573_s20  ;;  %s653_s9 = smov %s501_s10 }
  0x5d   : > { %s654_s10 = smov %s656_s14  ;;  %16 = sbr.rel (!%p14_p2) target bundleno = 6 (0x6), region = 69 }
  0x62   :  { %244 = vsyncpa [#allocation3], 1 }
  0x63   :  { %246 = vsyncpa [#allocation3 + $0x1], 1 }
  0x64   :  { %247 = vsyncpa [#allocation4], 1 }
  0x65   :  { %249 = vsyncpa [#allocation4 + $0x1], 1 }

</bundles_post_ra>
